<compile_context>
chip_gen: v7x
topology: tpu7x:2x2x1
jax: 0.10.0
libtpu: 0.0.40
codegen_flags: <defaults>
</compile_context>

<pallas_src>
import jax
import jax.numpy as jnp
import numpy as np
from jax import lax
from jax.experimental import pallas as pl
from jax.experimental.pallas import tpu as pltpu


# ----------------------------- hardware / budgets --------------------------- #

def _round_up(a, b):
    return (a + b - 1) // b * b


def _tpu_vmem_capacity():
    try:
        info = pltpu.get_tpu_info()
        cap = getattr(info, "vmem_capacity_bytes", None)
        if cap:
            return int(cap)
    except Exception:
        pass
    return 64 << 20  # conservative (v7x-class)


def _act_budget_bytes(vmem_cap):
    # Per-step activation-block budget; bigger tiles on 128 MiB-VMEM chips (v5e/v6e).
    return (7 << 20) if vmem_cap <= (64 << 20) else (14 << 20)


def _vmem_limit(bytes_per_step, vmem_cap):
    # 48 MiB ceiling on v7x (64 MiB physical), ~100 MiB on v5e/v6e (128 MiB physical).
    ceiling = (48 << 20) if vmem_cap <= (64 << 20) else (100 << 20)
    want = 2 * bytes_per_step + (6 << 20)
    return int(min(max(want, 24 << 20), ceiling))


def _divisor_tiles(n, step):
    cands = [t for t in range(step, n, step) if n % t == 0]
    cands.append(n)
    return cands


def _maybe_single_buffer(block_shape, index_map, *, resident, nbytes):
    """Single-buffer large grid-invariant (weight) blocks; guarded for API availability."""
    if resident and nbytes >= (4 << 20) and hasattr(pl, "Buffered"):
        try:
            return pl.BlockSpec(block_shape, index_map, pipeline_mode=pl.Buffered(1))
        except Exception:
            pass
    return pl.BlockSpec(block_shape, index_map)


# ----------------------------- Pallas kernels ------------------------------- #

def _conv_parity_kernel(x00l_ref, x01_ref, x00r_ref,
                        x10l_ref, x11_ref, x10r_ref,
                        w_ref, b_ref, o_ref):
    # x00l/x01/x00r: (1, th+1, wp, C_in)  even input rows, cols {left, middle, right}
    # x10l/x11/x10r: (1, th,   wp, C_in)  odd  input rows
    # w_ref: (9, C_in, tc_out) tap-major weights (k = 3*ky + kx), VMEM-resident
    # b_ref: (1, tc_out) f32 bias; o_ref: (1, th*wp, tc_out)
    th = x10l_ref.shape[1]
    wp = x10l_ref.shape[2]
    c_in = w_ref.shape[1]
    tp = th * wp

    def tap_dot(v, k):
        # (th, wp, C_in) -> (tp, C_in): layout-free collapse (wp is sublane-aligned).
        return jnp.dot(v.reshape(tp, c_in), w_ref[k],
                       preferred_element_type=jnp.float32)

    e00l = x00l_ref[0]
    e01 = x01_ref[0]
    e00r = x00r_ref[0]

    acc = tap_dot(e00l[:th], 0)        # (ky, kx) = (0, 0)
    acc += tap_dot(e01[:th], 1)        # (0, 1)
    acc += tap_dot(e00r[:th], 2)       # (0, 2)
    acc += tap_dot(x10l_ref[0], 3)     # (1, 0)
    acc += tap_dot(x11_ref[0], 4)      # (1, 1)
    acc += tap_dot(x10r_ref[0], 5)     # (1, 2)
    acc += tap_dot(e00l[1:], 6)        # (2, 0)
    acc += tap_dot(e01[1:], 7)         # (2, 1)
    acc += tap_dot(e00r[1:], 8)        # (2, 2)

    o_ref[0] = (acc + b_ref[...]).astype(o_ref.dtype)


def _conv_im2col_kernel(x_ref, w_ref, b_ref, o_ref):
    # x_ref: (1, tp, 9*C_in); w_ref: (9*C_in, tc_out); b_ref: (1, tc_out)
    acc = jnp.dot(x_ref[0], w_ref[...], preferred_element_type=jnp.float32)
    o_ref[0] = (acc + b_ref[...]).astype(o_ref.dtype)


def _avgpool_kernel(x_ref, s_ref, o_ref):
    # x_ref: (1, tc, th, 2*W) -- lanes hold [row 2r | row 2r+1] of the original image.
    # s_ref: (2*W, W_out) constant averaging matrix (0.25 at the four taps of each col).
    # o_ref: (1, tc, th, W_out)  (NCHW output block)
    tc = x_ref.shape[1]
    th = x_ref.shape[2]
    w2 = x_ref.shape[3]
    w_out = o_ref.shape[3]
    v = x_ref[0].reshape(tc * th, w2)
    pooled = jnp.dot(v, s_ref[...], preferred_element_type=jnp.float32)
    o_ref[0] = pooled.reshape(tc, th, w_out).astype(o_ref.dtype)


# ------------------------------ JAX wrappers -------------------------------- #

def _pick_im2col_tile(p, k_in, tc_out, itemsize, budget):
    cands = _divisor_tiles(p, 8)

    def bytes_for(t):
        return t * k_in * itemsize + t * tc_out * (itemsize + 4)

    fitting = [t for t in cands if bytes_for(t) <= budget]
    return max(fitting) if fitting else min(cands, key=bytes_for)


@jax.jit
def _conv_downsample_2d(x, weight, bias):
    """Conv2d(k=3, stride=2, pad=1) on the MXU (parity-split or folded-im2col path)."""
    N, C_in, H, W = x.shape
    C_out = weight.shape[0]
    H_out = (H - 1) // 2 + 1
    W_out = (W - 1) // 2 + 1
    P = H_out * W_out
    itemsize = jnp.dtype(x.dtype).itemsize
    sub = max(8, 32 // itemsize)          # sublane tile for the input dtype

    vmem_cap = _tpu_vmem_capacity()
    budget = _act_budget_bytes(vmem_cap)

    # C_out grid axis (v7x two-TC sharding / MXU width); keep last output dim >= 128.
    tc_out = 256 if (C_out > 256 and C_out % 256 == 0) else C_out
    nc = C_out // tc_out

    # One NHWC transpose pass, then all tap extraction strides hit non-minor dims.
    x_nhwc = jnp.transpose(x, (0, 2, 3, 1))
    xp = jnp.pad(x_nhwc, ((0, 0), (1, 1), (1, 1), (0, 0)))

    wp = _round_up(W_out, sub)            # pad cols so (rows, wp, C)->(rows*wp, C) is free
    parity_act_bytes = (3 * (H_out + 1) + 3 * H_out) * wp * C_in * itemsize
    use_parity = (C_in >= 64) and (parity_act_bytes <= budget)

    b2d = bias.reshape(1, C_out).astype(jnp.float32)

    if use_parity:
        # ---- parity / left-right split: 6 slabs, every tap a contiguous slice ----
        def par(r0, c0, rows):
            v = xp[:, r0:r0 + 2 * rows - 1:2, c0:c0 + 2 * W_out - 1:2, :]
            if wp != W_out:
                v = jnp.pad(v, ((0, 0), (0, 0), (0, wp - W_out), (0, 0)))
            return v

        re = H_out + 1
        x00l, x01, x00r = par(0, 0, re), par(0, 1, re), par(0, 2, re)
        x10l, x11, x10r = par(1, 0, H_out), par(1, 1, H_out), par(1, 2, H_out)

        # weight (C_out, C_in, 3, 3) -> (9, C_in, C_out), tap k = 3*ky + kx.
        wtaps = jnp.transpose(weight, (2, 3, 1, 0)).reshape(9, C_in, C_out)
        wtaps = wtaps.astype(x.dtype)     # bf16 inputs -> bf16 MXU operands, f32 acc

        tp = H_out * wp
        w_bytes = 9 * C_in * tc_out * itemsize
        step_bytes = (parity_act_bytes + w_bytes + tc_out * 4
                      + tp * tc_out * (itemsize + 4))   # out block + f32 accumulator

        act_spec_e = pl.BlockSpec((1, re, wp, C_in), lambda n, j: (n, 0, 0, 0))
        act_spec_o = pl.BlockSpec((1, H_out, wp, C_in), lambda n, j: (n, 0, 0, 0))
        w_spec = _maybe_single_buffer((9, C_in, tc_out), lambda n, j: (0, 0, j),
                                      resident=(nc == 1), nbytes=w_bytes)
        b_spec = pl.BlockSpec((1, tc_out), lambda n, j: (0, j))

        out = pl.pallas_call(
            _conv_parity_kernel,
            out_shape=jax.ShapeDtypeStruct((N, tp, C_out), x.dtype),
            grid=(N, nc),
            in_specs=[act_spec_e, act_spec_e, act_spec_e,
                      act_spec_o, act_spec_o, act_spec_o,
                      w_spec, b_spec],
            out_specs=pl.BlockSpec((1, tp, tc_out), lambda n, j: (n, 0, j)),
            compiler_params=pltpu.CompilerParams(
                dimension_semantics=("parallel", "parallel"),
                vmem_limit_bytes=_vmem_limit(step_bytes, vmem_cap)),
        )(x00l, x01, x00r, x10l, x11, x10r, wtaps, b2d)

        out = out.reshape(N, H_out, wp, C_out)[:, :, :W_out, :]
        return jnp.transpose(out, (0, 3, 1, 2))          # NHWC -> NCHW (output-sized)

    # ---- folded im2col: one (tp, 9*C_in) @ (9*C_in, C_out) dot per step ----
    taps = []
    for ky in range(3):
        for kx in range(3):
            v = xp[:, ky:ky + 2 * H_out - 1:2, kx:kx + 2 * W_out - 1:2, :]
            taps.append(v.reshape(N, P, C_in))
    xcol = jnp.concatenate(taps, axis=-1)                 # (N, P, 9*C_in)

    wcol = jnp.transpose(weight, (2, 3, 1, 0)).reshape(9 * C_in, C_out)
    wcol = wcol.astype(x.dtype)

    tp = _pick_im2col_tile(P, 9 * C_in, tc_out, itemsize, budget)
    n_p = P // tp
    w_bytes = 9 * C_in * tc_out * itemsize
    step_bytes = (tp * 9 * C_in * itemsize + w_bytes + tc_out * 4
                  + tp * tc_out * (itemsize + 4))

    w_spec = _maybe_single_buffer((9 * C_in, tc_out), lambda n, i, j: (0, j),
                                  resident=(nc == 1), nbytes=w_bytes)
    b_spec = pl.BlockSpec((1, tc_out), lambda n, i, j: (0, j))

    out = pl.pallas_call(
        _conv_im2col_kernel,
        out_shape=jax.ShapeDtypeStruct((N, P, C_out), x.dtype),
        grid=(N, n_p, nc),
        in_specs=[pl.BlockSpec((1, tp, 9 * C_in), lambda n, i, j: (n, i, 0)),
                  w_spec, b_spec],
        out_specs=pl.BlockSpec((1, tp, tc_out), lambda n, i, j: (n, i, j)),
        compiler_params=pltpu.CompilerParams(
            dimension_semantics=("parallel", "parallel", "parallel"),
            vmem_limit_bytes=_vmem_limit(step_bytes, vmem_cap)),
    )(xcol, wcol, b2d)

    out = out.reshape(N, H_out, W_out, C_out)
    return jnp.transpose(out, (0, 3, 1, 2))


def _pick_pool_tiles(C, H_out, W, W_out, itemsize, sub, budget):
    tc_cands = _divisor_tiles(C, 8)
    th_cands = _divisor_tiles(H_out, sub)

    def bytes_for(tc, th):
        return tc * th * (2 * W + W_out) * itemsize + tc * th * W_out * 4

    best = None
    for tc in tc_cands:
        for th in th_cands:
            if bytes_for(tc, th) <= budget and (best is None or tc * th > best[0]):
                best = (tc * th, tc, th)
    if best is None:
        return min(((tc, th) for tc in tc_cands for th in th_cands),
                   key=lambda p: bytes_for(*p))
    return best[1], best[2]


@jax.jit
def _avgpool_downsample_2d(x):
    """AvgPool2d(2, 2): fused NCHW-in / NCHW-out kernel, one small MXU dot per block."""
    assert jnp.issubdtype(x.dtype, jnp.floating)
    N, C, H, W = x.shape
    H_out, W_out = H // 2, W // 2                    # floor, matching AvgPool2d default
    if H % 2:
        x = x[:, :, :2 * H_out, :]                   # odd trailing row is dropped
    # Free (metadata-only) reshape: lanes hold [row 2r, cols 0..W-1 | row 2r+1, cols ...]
    xr = x.reshape(N, C, H_out, 2 * W)

    itemsize = jnp.dtype(x.dtype).itemsize
    sub = max(8, 32 // itemsize)
    vmem_cap = _tpu_vmem_capacity()
    budget = _act_budget_bytes(vmem_cap)
    tc, th = _pick_pool_tiles(C, H_out, W, W_out, itemsize, sub, budget)
    n_c, n_h = C // tc, H_out // th

    # Constant averaging matrix: out[.., j] = 0.25*(x[2j] + x[2j+1] + x[W+2j] + x[W+2j+1]).
    s = np.zeros((2 * W, W_out), np.float32)
    idx = np.arange(W_out)
    for off in (0, 1):
        s[2 * idx + off, idx] = 0.25
        s[W + 2 * idx + off, idx] = 0.25
    s = jnp.asarray(s).astype(x.dtype)               # 0.25 exact in bf16/f16/f32

    in_bytes = tc * th * 2 * W * itemsize
    out_bytes = tc * th * W_out * itemsize
    misc = 2 * W * W_out * itemsize + tc * th * W_out * 4

    return pl.pallas_call(
        _avgpool_kernel,
        out_shape=jax.ShapeDtypeStruct((N, C, H_out, W_out), x.dtype),
        grid=(N, n_c, n_h),
        in_specs=[pl.BlockSpec((1, tc, th, 2 * W), lambda n, c, i: (n, c, i, 0)),
                  pl.BlockSpec((2 * W, W_out), lambda n, c, i: (0, 0))],
        out_specs=pl.BlockSpec((1, tc, th, W_out), lambda n, c, i: (n, c, i, 0)),
        compiler_params=pltpu.CompilerParams(
            dimension_semantics=("parallel", "parallel", "parallel"),
            vmem_limit_bytes=_vmem_limit(in_bytes + out_bytes + misc, vmem_cap)),
    )(xr, s)


class Downsample:
    """JAX/Pallas port of the PyTorch Downsample module (dims=2 only)."""

    def __init__(self, channels, use_conv, dims=2, out_channels=None, *, key=None):
        assert dims == 2, "only dims=2 implemented"  # TODO(synk): dims=1/3 variants
        self.channels = channels
        self.out_channels = out_channels or channels
        self.use_conv = use_conv
        self.dims = dims
        if use_conv:
            key = key if key is not None else jax.random.PRNGKey(0)
            kw, kb = jax.random.split(key)
            fan_in = channels * 3 * 3
            bound = 1.0 / np.sqrt(fan_in)            # PyTorch Conv2d default init range
            self.weight = jax.random.uniform(
                kw, (self.out_channels, channels, 3, 3),
                minval=-bound, maxval=bound, dtype=jnp.float32)
            self.bias = jax.random.uniform(
                kb, (self.out_channels,), minval=-bound, maxval=bound,
                dtype=jnp.float32)
        else:
            assert self.channels == self.out_channels
            self.weight = None
            self.bias = None

    def __call__(self, x):
        assert x.shape[1] == self.channels
        if self.use_conv:
            return _conv_downsample_2d(x, self.weight, self.bias)
        return _avgpool_downsample_2d(x)


# --------------------------------- main ------------------------------------ #

if __name__ == "__main__":
    key = jax.random.PRNGKey(0)
    k1, k2, k3 = jax.random.split(key, 3)

    # --- conv path, small C_in (folded single-matmul / im2col kernel) ---
    N, C, H, W = 2, 4, 16, 16
    x = jax.random.normal(k1, (N, C, H, W), dtype=jnp.float32)
    ds_conv = Downsample(channels=C, use_conv=True, dims=2, out_channels=C, key=k2)
    y_conv = jax.block_until_ready(ds_conv(x))
    ref_conv = lax.conv_general_dilated(
        x, ds_conv.weight, window_strides=(2, 2), padding=((1, 1), (1, 1)),
        dimension_numbers=("NCHW", "OIHW", "NCHW"),
        precision=lax.Precision.HIGHEST,
    ) + ds_conv.bias.reshape(1, C, 1, 1)
    assert y_conv.shape == (N, C, H // 2, W // 2)
    np.testing.assert_allclose(np.asarray(y_conv), np.asarray(ref_conv),
                               rtol=1e-4, atol=1e-4)

    # --- conv path, larger C_in (parity / 9-tap-matmul kernel) ---
    C2 = 128
    x2 = jax.random.normal(k3, (1, C2, 16, 16), dtype=jnp.float32)
    ds_conv2 = Downsample(channels=C2, use_conv=True, dims=2, out_channels=C2,
                          key=jax.random.PRNGKey(1))
    y_conv2 = jax.block_until_ready(ds_conv2(x2))
    ref_conv2 = lax.conv_general_dilated(
        x2, ds_conv2.weight, window_strides=(2, 2), padding=((1, 1), (1, 1)),
        dimension_numbers=("NCHW", "OIHW", "NCHW"),
        precision=lax.Precision.HIGHEST,
    ) + ds_conv2.bias.reshape(1, C2, 1, 1)
    assert y_conv2.shape == (1, C2, 8, 8)
    np.testing.assert_allclose(np.asarray(y_conv2), np.asarray(ref_conv2),
                               rtol=2e-4, atol=2e-4)

    # --- avg-pool path ---
    ds_pool = Downsample(channels=C, use_conv=False, dims=2)
    y_pool = jax.block_until_ready(ds_pool(x))
    ref_pool = x.reshape(N, C, H // 2, 2, W // 2, 2).mean(axis=(3, 5))
    assert y_pool.shape == (N, C, H // 2, W // 2)
    np.testing.assert_allclose(np.asarray(y_pool), np.asarray(ref_pool),
                               rtol=1e-5, atol=1e-5)

    print("KERNEL_OK")
</pallas_src>

<mosaic_0001>
module attributes {stable_mosaic.version = 11 : i64} {
  func.func @_conv_im2col_kernel(%arg0: i32, %arg1: i32, %arg2: i32, %arg3: memref<1x64x36xf32, #tpu.memory_space<vmem>>, %arg4: memref<36x4xf32, #tpu.memory_space<vmem>>, %arg5: memref<1x4xf32, #tpu.memory_space<vmem>>, %arg6: memref<1x64x4xf32, #tpu.memory_space<vmem>>) attributes {dimension_semantics = [#tpu.dimension_semantics<parallel>, #tpu.dimension_semantics<parallel>, #tpu.dimension_semantics<parallel>], iteration_bounds = array<i64: 2, 1, 1>, scalar_prefetch = 0 : i64, scratch_operands = 0 : i64, tpu.core_type = #tpu.core_type<tc>, window_params = [{transform_indices = @transform_0, window_bounds = array<i64: 1, 64, 36>}, {transform_indices = @transform_1, window_bounds = array<i64: 36, 4>}, {transform_indices = @transform_2, window_bounds = array<i64: 1, 4>}, {transform_indices = @transform_3, window_bounds = array<i64: 1, 64, 4>}]} {
    %c0 = arith.constant 0 : index
    %c0_0 = arith.constant 0 : index
    %c0_1 = arith.constant 0 : index
    %0 = vector.load %arg3[%c0, %c0_0, %c0_1] : memref<1x64x36xf32, #tpu.memory_space<vmem>>, vector<1x64x36xf32>
    %1 = vector.shape_cast %0 : vector<1x64x36xf32> to vector<64x36xf32>
    %c0_2 = arith.constant 0 : index
    %c0_3 = arith.constant 0 : index
    %2 = vector.load %arg4[%c0_2, %c0_3] : memref<36x4xf32, #tpu.memory_space<vmem>>, vector<36x4xf32>
    %cst = arith.constant dense<0.000000e+00> : vector<64x4xf32>
    %3 = tpu.matmul %1, %2, %cst {dimension_numbers = #tpu.dot_dimension_numbers<[1], [0], [0], [1], [0, 0, 1, 1], [], []>} : vector<64x36xf32>, vector<36x4xf32>, vector<64x4xf32> -> vector<64x4xf32>
    %c0_4 = arith.constant 0 : index
    %c0_5 = arith.constant 0 : index
    %4 = vector.load %arg5[%c0_4, %c0_5] : memref<1x4xf32, #tpu.memory_space<vmem>>, vector<1x4xf32>
    %5 = vector.broadcast %4 : vector<1x4xf32> to vector<64x4xf32>
    %6 = arith.addf %3, %5 : vector<64x4xf32>
    %c0_6 = arith.constant 0 : index
    %c0_7 = arith.constant 0 : index
    %c0_8 = arith.constant 0 : index
    %7 = vector.load %arg6[%c0_6, %c0_7, %c0_8] : memref<1x64x4xf32, #tpu.memory_space<vmem>>, vector<1x64x4xf32>
    %8 = vector.shape_cast %7 : vector<1x64x4xf32> to vector<64x4xf32>
    %9 = vector.shape_cast %6 : vector<64x4xf32> to vector<1x64x4xf32>
    tpu.vector_store %arg6[%c0_6, %c0_7, %c0_8], %9 {strides = array<i32>} : memref<1x64x4xf32, #tpu.memory_space<vmem>>, vector<1x64x4xf32>,
    return
  }
  func.func @transform_0(%arg0: i32, %arg1: i32, %arg2: i32) -> (i32, i32, i32) {
    %c0_i32 = arith.constant 0 : i32
    %c0_i32_0 = arith.constant 0 : i32
    return %arg0, %arg1, %c0_i32 : i32, i32, i32
  }
  func.func @transform_1(%arg0: i32, %arg1: i32, %arg2: i32) -> (i32, i32) {
    %c0_i32 = arith.constant 0 : i32
    %c0_i32_0 = arith.constant 0 : i32
    return %c0_i32, %arg2 : i32, i32
  }
  func.func @transform_2(%arg0: i32, %arg1: i32, %arg2: i32) -> (i32, i32) {
    %c0_i32 = arith.constant 0 : i32
    %c0_i32_0 = arith.constant 0 : i32
    return %c0_i32, %arg2 : i32, i32
  }
  func.func @transform_3(%arg0: i32, %arg1: i32, %arg2: i32) -> (i32, i32, i32) {
    %c0_i32 = arith.constant 0 : i32
    return %arg0, %arg1, %arg2 : i32, i32, i32
  }
}

</mosaic_0001>

<bundles_post_ra>
// kernel: _conv_downsample_2d.1
= control target key start
LH: loop header
LB: loop body
LE: loop exit
PB: predicated region body
PF: predicated region fallthrough
CT: control target
= control target key end

     0   :  { %s688_s12 = smov 0   ;;  %s690_s13 = smov 0   ;;  %s762_s0 = inlined_call_operand.vmem [shape: f32[2,64,36], index: 0, kind: input, shape index: {}]   ;;  %s763_s1 = inlined_call_operand.vmem [shape: f32[36,4], index: 1, kind: input, shape index: {}]   ;;  %s764_s2 = inlined_call_operand.vmem [shape: f32[1,4], index: 2, kind: input, shape index: {}]   ;;  %s765_s3 = inlined_call_operand.vmem [shape: f32[2,64,4], index: 3, kind: output, shape index: {}]  }
   0x1   :  { %s692_s14 = smov 0  }
   0x2 LB: > { %s32_s15 = sadd.s32 1, %s662_s13  ;;  %p552_p0 = scmp.ge.s32.totalorder %s666_s14, 1  ;;  %s666_s14 = sphi %s692_s14, %s13_s14   ;;  %s662_s13 = sphi %s690_s13, %s767_s13   ;;  %s658_s12 = sphi %s688_s12, %s766_s12  }
   0x3   : > { %p34_p1 = scmp.ge.s32.totalorder %s32_s15, 2  ;;  %p184_p2 = scmp.lt.s32.totalorder %s666_s14, 3 }
   0x5   : > { %s769_s15 = smov (%p34_p1, %s32_s15), 0  ;;  %p185_p3 = pnand %p552_p0, %p184_p2 }
   0x6   : > { %v264_v0 = vld [vmem:[%s763_s1] sm:$0xff] (!%p185_p3)  ;;  %v265_v1 = vld [vmem:[%s763_s1 + $0x8] sm:$0xff] (!%p185_p3)  ;;  %v266_v2 = vld [vmem:[%s763_s1 + $0x10] sm:$0xff] (!%p185_p3)  ;;  %p227_p4 = scmp.lt.s32.totalorder (!%p185_p3), %s658_s12, 1  ;;  %vm276_vm0 = vcmask (!%p185_p3), 293888   ;;  %vm301_vm1 = vcmask (!%p185_p3), 1043456  }
   0x7   : > { %188 = sbr.rel (%p185_p3) target bundleno = 240 (0xf0), region = 32  ;;  %v606_v3 = vpack.c.bf16 (!%p185_p3), %v265_v1, %v264_v0  ;;  %v267_v4 = vld [vmem:[%s763_s1 + $0x18] sm:$0xff] (!%p185_p3)  ;;  %v268_v6 = vld [vmem:[%s763_s1 + $0x20] sm:$0xf] (!%p185_p3)  ;;  %vm410_vm2 = vcmask (!%p185_p3), 31744  }
   0x8   : > { %v610_v5 = vpack.c.bf16 (!%p185_p3), %v267_v4, %v266_v2  ;;  %v557_v15 = vld [vmem:[%s764_s2] ss:$0 sm:$0xff] (!%p185_p3) }
   0x9   : > { %607 = vmatprep.subr.bf16.mxu0 (!%p185_p3), %v606_v3  ;;  %614 = vmatprep.subr.bf16.mxu1 (!%p185_p3), %v606_v3 }
   0xa   : > { %609 = vmatpush3.bf16.msra.mxu0 (!%p185_p3), %v606_v3  ;;  %617 = vmatpush3.bf16.msra.mxu1 (!%p185_p3), %v606_v3 }
   0xb   : > { %611 = vmatprep.subr.bf16.mxu0 (!%p185_p3), %v610_v5  ;;  %615 = vmatprep.subr.bf16.mxu1 (!%p185_p3), %v610_v5 }
   0xe   : > { %s771_s12 = smov (!%p227_p4, %s658_s12), 1  ;;  %613 = vmatpush3.bf16.msra.mxu0 %v610_v5  ;;  %618 = vmatpush3.bf16.msra.mxu1 %v610_v5 }
   0xf   : > { %s569_s24 = sshll.u32 %s771_s12, 6  ;;  %592 = vmatprep.subr.msk.mxu0 %vm301_vm1, %v268_v6  ;;  %616 = vmatprep.subr.msk.mxu1 %vm301_vm1, %v268_v6 }
  0x10   : > { %s234_s27 = scalar_lea.vmem %s762_s0, %s569_s24  ;;  %s254_s7 = scalar_lea.vmem %s765_s3, %s569_s24 }
  0x11   : > { %v256_v7 = vld [vmem:[%s234_s27] sm:$0xff]  ;;  %v257_v9 = vld [vmem:[%s234_s27 + $0x8] sm:$0xff]  ;;  %v258_v11 = vld [vmem:[%s234_s27 + $0x10] sm:$0xff] }
  0x12   : > { %v260_v8 = vld [vmem:[%s234_s27 + $0x20] sm:$0xff]  ;;  %594 = vmatprep.mubr.msk.f32.mxu0 %vm276_vm0, %v256_v7  ;;  %v261_v10 = vld [vmem:[%s234_s27 + $0x28] sm:$0xff]  ;;  %v262_v12 = vld [vmem:[%s234_s27 + $0x30] sm:$0xff]  ;;  %593 = vmatpush3.msk.msra.mxu0 %vm301_vm1, %v268_v6 }
  0x13   : > { %600 = vmatprep.mubr.msk.f32.mxu1 %vm276_vm0, %v260_v8  ;;  %619 = vmatpush3.msk.msra.mxu1 %vm301_vm1, %v268_v6  ;;  %v259_v13 = vld [vmem:[%s234_s27 + $0x18] sm:$0xff] }
  0x14   : > { %595 = vmatmul.mubr.msk.f32.vlgmr.msra.gmra.mrb[0].mxu0 %vm276_vm0, %v257_v9  ;;  %601 = vmatmul.mubr.msk.f32.vlgmr.msra.gmra.mrb[0].mxu1 %vm276_vm0, %v261_v10  ;;  %v263_v14 = vld [vmem:[%s234_s27 + $0x38] sm:$0xff] }
  0x15   : > { %597 = vmatprep.mubr.msk.f32.mxu0 %vm276_vm0, %v258_v11  ;;  %603 = vmatprep.mubr.msk.f32.mxu1 %vm276_vm0, %v262_v12 }
  0x18   : > { %598 = vmatmul.mubr.msk.f32.gmra.mrb[2].mxu0 %vm276_vm0, %v259_v13  ;;  %604 = vmatmul.mubr.msk.f32.gmra.mrb[2].mxu1 %vm276_vm0, %v263_v14 }
  0xe7   : > { %v596_v16 = vpop.f32.mrb[0].mxu0  ;;  %v602_v17 = vpop.f32.mrb[0].mxu1 }
  0xe8   : > { %v377_v18 = vadd.f32 %v596_v16, %v557_v15  ;;  %v397_v19 = vadd.f32 %v602_v17, %v557_v15  ;;  %v371_v20 = vpop.f32.mrb[1].mxu0  ;;  %v391_v21 = vpop.f32.mrb[1].mxu1 }
  0xe9   : > { %v372_v22 = vadd.f32 %v557_v15, %v371_v20  ;;  %v392_v23 = vadd.f32 %v557_v15, %v391_v21 }
  0xea   : > { %412 = vst.msk [vmem:[%s254_s7 + $0x8] sm:$0xff] %vm410_vm2, %v377_v18  ;;  %416 = vst.msk [vmem:[%s254_s7 + $0x28] sm:$0xff] %vm410_vm2, %v397_v19 }
  0xeb   : > { %411 = vst.msk [vmem:[%s254_s7] sm:$0xff] %vm410_vm2, %v372_v22  ;;  %415 = vst.msk [vmem:[%s254_s7 + $0x20] sm:$0xff] %vm410_vm2, %v392_v23  ;;  %v599_v24 = vpop.f32.mrb[2].mxu0  ;;  %v605_v25 = vpop.f32.mrb[2].mxu1 }
  0xec   : > { %v387_v26 = vadd.f32 %v599_v24, %v557_v15  ;;  %v407_v27 = vadd.f32 %v605_v25, %v557_v15  ;;  %v381_v28 = vpop.f32.mrb[3].mxu0  ;;  %v401_v29 = vpop.f32.mrb[3].mxu1 }
  0xed   : > { %v382_v30 = vadd.f32 %v557_v15, %v381_v28  ;;  %v402_v31 = vadd.f32 %v557_v15, %v401_v29 }
  0xee   : > { %414 = vst.msk [vmem:[%s254_s7 + $0x18] sm:$0xff] %vm410_vm2, %v387_v26  ;;  %418 = vst.msk [vmem:[%s254_s7 + $0x38] sm:$0xff] %vm410_vm2, %v407_v27 }
  0xef   : > { %413 = vst.msk [vmem:[%s254_s7 + $0x10] sm:$0xff] %vm410_vm2, %v382_v30  ;;  %417 = vst.msk [vmem:[%s254_s7 + $0x30] sm:$0xff] %vm410_vm2, %v402_v31 }
  0xf0 PF: > { %s13_s14 = sadd.s32 1, %s666_s14   ;;  %s766_s12 = smov %s662_s13 }
  0xf1   : > { %p10_p5 = scmp.ge.s32.totalorder %s13_s14, 4   ;;  %s767_s13 = smov %s769_s15 }
  0xf3   :  { %12 = sbr.rel (!%p10_p5) target bundleno = 2 (0x2), region = 68 }

</bundles_post_ra>
